<compile_context>
chip_gen: v5e
topology: v5e:2x2
jax: 0.10.0
libtpu: 0.0.40
codegen_flags: <defaults>
</compile_context>

<pallas_src>
import jax
import jax.numpy as jnp
from jax.experimental import pallas as pl
from jax.experimental.pallas import tpu as pltpu


# ----------------------------------------------------------------------------
# Kernel body: whole-tile copy (one vld + one vst per vreg, purely mem-bound).
# ----------------------------------------------------------------------------
def _identity_kernel(x_ref, o_ref):
    o_ref[...] = x_ref[...]


# Tuning knobs (conservative across v5e / v6e / v7x).
_SMALL_SINGLE_BLOCK_BYTES = 2 * 1024 * 1024   # whole array as one VMEM block
_TARGET_TILE_BYTES = 2 * 1024 * 1024          # per-buffer tile (v7x-safe; 4 live bufs ~ 8 MiB)
_VMEM_LIMIT_BYTES = 32 * 1024 * 1024          # safe on v5e/v6e/v7x
_MAX_LANE_WIDTH = 4096                        # widest lane-dense last dim tried


def _copy_single_block(x2d):
    """One full-extent block, grid=(): no step overhead, no (8,128) constraint."""
    return pl.pallas_call(
        _identity_kernel,
        out_shape=jax.ShapeDtypeStruct(x2d.shape, x2d.dtype),
        in_specs=[pl.BlockSpec(memory_space=pltpu.MemorySpace.VMEM)],
        out_specs=pl.BlockSpec(memory_space=pltpu.MemorySpace.VMEM),
    )(x2d)


def _copy_tiled_2d(x2d, tile_rows):
    """Lane-dense (rows, K*128) copy tiled over rows."""
    rows, cols = x2d.shape
    grid = (rows // tile_rows,)
    return pl.pallas_call(
        _identity_kernel,
        out_shape=jax.ShapeDtypeStruct((rows, cols), x2d.dtype),
        grid_spec=pltpu.PrefetchScalarGridSpec(
            num_scalar_prefetch=0,
            grid=grid,
            in_specs=[pl.BlockSpec((tile_rows, cols), lambda i: (i, 0))],
            out_specs=pl.BlockSpec((tile_rows, cols), lambda i: (i, 0)),
        ),
        compiler_params=pltpu.CompilerParams(
            dimension_semantics=("parallel",),
            vmem_limit_bytes=_VMEM_LIMIT_BYTES,
        ),
    )(x2d)


def _copy_tiled_3d(x3d, tile_lead):
    """(lead, H, W) copy: trailing two dims stay full-extent (exempt from (8,128))."""
    lead, h, w = x3d.shape
    grid = (lead // tile_lead,)
    return pl.pallas_call(
        _identity_kernel,
        out_shape=jax.ShapeDtypeStruct((lead, h, w), x3d.dtype),
        grid_spec=pltpu.PrefetchScalarGridSpec(
            num_scalar_prefetch=0,
            grid=grid,
            in_specs=[pl.BlockSpec((tile_lead, h, w), lambda i: (i, 0, 0))],
            out_specs=pl.BlockSpec((tile_lead, h, w), lambda i: (i, 0, 0)),
        ),
        compiler_params=pltpu.CompilerParams(
            dimension_semantics=("parallel",),
            vmem_limit_bytes=_VMEM_LIMIT_BYTES,
        ),
    )(x3d)


def _largest_divisor_tile(n, cap, multiple):
    """Largest t <= cap with t % multiple == 0 and n % t == 0, else None."""
    best = None
    cap = min(cap, n)
    t = multiple
    while t <= cap:
        if n % t == 0:
            best = t
        t += multiple
    return best


def materialized_identity(feat):
    """Identity implemented as a pad/slice-free Pallas copy (new array)."""
    shape = feat.shape
    itemsize = feat.dtype.itemsize
    total = int(feat.size)
    total_bytes = total * itemsize

    # --- small inputs (covers the test case): single full-extent block -------
    if total_bytes <= _SMALL_SINGLE_BLOCK_BYTES:
        if total % 128 == 0:
            view = feat.reshape(total // 128, 128)   # lane-dense, free reshape
        else:
            view = feat.reshape(1, total)
        return _copy_single_block(view).reshape(shape)

    # --- large inputs, preferred path: wide lane-dense 2-D slab, tiled rows --
    if total % 128 == 0:
        cols = 128
        for cand in (_MAX_LANE_WIDTH, 2048, 1024, 512, 256):
            if total % cand == 0:
                cols = cand
                break
        rows = total // cols
        max_tile_rows = max(8, _TARGET_TILE_BYTES // (cols * itemsize))
        tile_rows = _largest_divisor_tile(rows, max_tile_rows, 8)
        if tile_rows is not None:
            view = feat.reshape(rows, cols)          # contiguous reshape: free
            return _copy_tiled_2d(view, tile_rows).reshape(shape)

    # --- fallback for awkward sizes: full-extent trailing dims, tile leading --
    if feat.ndim >= 3:
        h, w = shape[-2], shape[-1]
        lead = total // (h * w)
        max_tile = max(1, _TARGET_TILE_BYTES // (h * w * itemsize))
        tile = _largest_divisor_tile(lead, max_tile, 1) or 1
        view = feat.reshape(lead, h, w)
        return _copy_tiled_3d(view, tile).reshape(shape)

    # --- last resort: one full-array block ----------------------------------
    # TODO(synk): masked ragged-tail tiling for huge 1-D/2-D arrays hitting this path.
    view = feat.reshape(1, total) if feat.ndim == 1 else feat
    return _copy_single_block(view).reshape(shape)


def feature_extractor_forward(feat, materialize=False):
    """Forward of FeatureExtractor.

    Default (materialize=False): return the input unchanged (zero HBM traffic,
    identical to the PyTorch module which aliases the input tensor).
    materialize=True: route through the Pallas identity-copy kernel.
    """
    if not materialize:
        return feat
    return materialized_identity(feat)


class FeatureExtractor:
    """JAX/Pallas equivalent of the PyTorch FeatureExtractor module."""

    def __init__(self, materialize=False):
        # No parameters in the original module.
        self.feature = None
        self._materialize = materialize

    def __call__(self, feat):
        out = feature_extractor_forward(feat, materialize=self._materialize)
        self.feature = out   # replicate the side effect of storing the feature
        return out


if __name__ == "__main__":
    key = jax.random.PRNGKey(0)
    # Small NCHW input consistent with a conv-feature tensor.
    x = jax.random.normal(key, (2, 4, 16, 16), dtype=jnp.float32)

    # Preferred path (matches PyTorch aliasing & perf feedback): no copy at all.
    model = FeatureExtractor()
    y = model(x)
    jax.block_until_ready(y)
    assert y.shape == x.shape and y.dtype == x.dtype
    assert bool(jnp.all(y == x))
    assert model.feature is y

    # Pallas kernel path: run the identity-copy kernel once and verify it.
    model_k = FeatureExtractor(materialize=True)
    yk = model_k(x)
    jax.block_until_ready(yk)
    assert yk.shape == x.shape and yk.dtype == x.dtype
    assert bool(jnp.all(yk == x))
    assert model_k.feature is yk

    print("KERNEL_OK")
</pallas_src>

<mosaic_0001>
module attributes {stable_mosaic.version = 11 : i64} {
  func.func @_identity_kernel(%arg0: memref<16x128xf32, #tpu.memory_space<vmem>>, %arg1: memref<16x128xf32, #tpu.memory_space<vmem>>) attributes {dimension_semantics = [], scalar_prefetch = 0 : i64, scratch_operands = 0 : i64, tpu.core_type = #tpu.core_type<tc>} {
    %c0 = arith.constant 0 : index
    %c0_0 = arith.constant 0 : index
    %0 = vector.load %arg0[%c0, %c0_0] : memref<16x128xf32, #tpu.memory_space<vmem>>, vector<16x128xf32>
    %c0_1 = arith.constant 0 : index
    %c0_2 = arith.constant 0 : index
    %1 = vector.load %arg1[%c0_1, %c0_2] : memref<16x128xf32, #tpu.memory_space<vmem>>, vector<16x128xf32>
    tpu.vector_store %arg1[%c0_1, %c0_2], %0 {strides = array<i32>} : memref<16x128xf32, #tpu.memory_space<vmem>>, vector<16x128xf32>,
    return
  }
}

</mosaic_0001>

<bundles_post_ra>
// kernel: tpu_custom_call.1
= control target key start
LH: loop header
LB: loop body
LE: loop exit
PB: predicated region body
PF: predicated region fallthrough
CT: control target
= control target key end

     0   :  { %6 = vsyncpa [#allocation3], 0  ;;  %s124_s0 = inlined_call_operand.hbm [shape: f32[16,128], index: 0, kind: input, shape index: {}]   ;;  %s125_s1 = inlined_call_operand.hbm [shape: f32[16,128], index: 1, kind: output, shape index: {}]  }
   0x1   :  { %7 = vsyncpa [#allocation4], 0  ;;  %s12_s8 = sshll.u32 %s124_s0, 4  ;;  %s104_s9 = smov [#allocation2]   ;;  %s13_s8 = int_to_ptr.hbm [resolvable:$true] %s12_s8 }
   0x2   :  { %s14_s10 = sshll.u32 %s104_s9, 4  ;;  %s105_s11 = smov 128   ;;  %s15_s10 = int_to_ptr.vmem [resolvable:$true] %s14_s10 }
   0x3   :  { %s106_s12 = smov 8  }
   0x4   :  { %20 = dma.hbm_to_vmem [thread:$0]  %s13_s8, 256, %s15_s10, [#allocation3], %s105_s11, %s105_s11, %s106_s12  }
   0x5   :  { %100 = dma.done.wait [#allocation3], 256  }
   0x6   :  { %101 = vsyncadd [#allocation3], 4294967040  ;;  %s107_s13 = smov [#allocation5]   ;;  %s35_s17 = sshll.u32 %s125_s1, 4  ;;  %v25_v0 = vld [vmem:[#allocation2] sm:$0xff]  ;;  %v26_v1 = vld [vmem:[#allocation2 + $0x8] sm:$0xff]  ;;  %s36_s17 = int_to_ptr.hbm [resolvable:$true] %s35_s17 }
   0x7   :  { %s33_s14 = sshll.u32 %s107_s13, 4  ;;  %27 = vst [vmem:[#allocation5] sm:$0xff] %v25_v0  ;;  %s34_s14 = int_to_ptr.vmem [resolvable:$true] %s33_s14 }
   0x8   :  { %28 = vst [vmem:[#allocation5 + $0x8] sm:$0xff] %v26_v1 }
   0x9   :  { %41 = dma.vmem_to_hbm [thread:$0]  %s34_s14, 256, %s36_s17, [#allocation4], %s105_s11, %s105_s11, %s106_s12  }
   0xa   :  { %102 = dma.done.wait [#allocation4], 256  }
   0xb   :  { %103 = vsyncadd [#allocation4], 4294967040 }
   0xc   :  { %46 = vsyncpa [#allocation3], 1 }
   0xd   :  { %47 = vsyncpa [#allocation4], 1 }

</bundles_post_ra>
